<compile_context>
chip_gen: v6e
topology: v6e:2x2x1
jax: 0.10.0
libtpu: 0.0.40
codegen_flags: <defaults>
</compile_context>

<pallas_src>
import functools

import jax
import jax.numpy as jnp
from jax import lax
from jax.experimental import pallas as pl
from jax.experimental.pallas import tpu as pltpu


def _normalize_kernel(x_ref, o_ref, *, power):
    # Block layout: (TB, C, S, 128) on the aligned path, (TB, C, T) on the fallback path.
    # In both cases the reduction (channel) axis is axis=1.
    x = x_ref[...].astype(jnp.float32)

    if power == 2:
        s = jnp.sum(x * x, axis=1, keepdims=True)       # per-lane VPU adds over C
        inv = lax.rsqrt(s)                               # 1/norm, once per lane (EUP)
    else:
        if isinstance(power, int) and power > 0:
            xp = x
            for _ in range(power - 1):                   # multiply chain, no EUP per elem
                xp = xp * x
        else:
            xp = jnp.power(x, power)
        s = jnp.sum(xp, axis=1, keepdims=True)
        if isinstance(power, int) and power > 0 and (power & (power - 1)) == 0:
            # power-of-two p: sqrt chain + rsqrt (single-EUP ops, avoids pow -> log+exp)
            t = s
            k = power
            while k > 2:
                t = jnp.sqrt(t)
                k //= 2
            inv = lax.rsqrt(t)
        else:
            inv = jnp.exp(jnp.log(s) * (-1.0 / power))   # s^(-1/p), once per lane

    # TODO(synk): for bf16 inputs on v6e/v7x the final scale could be done in native dtype
    # (x_ref[...] * inv.astype) to avoid holding the f32 upcast; kept in f32 for v5e safety.
    o_ref[...] = (x * inv).astype(o_ref.dtype)


def _round_up(v, m):
    return ((v + m - 1) // m) * m


# Scoped VMEM limit: 48 MiB is safe on v7x (64 MiB physical) and raises v5e's 16 MiB
# scoped default; v6e/v5e have 128 MiB physical so this is never a constraint there.
_VMEM_LIMIT_BYTES = 48 * 1024 * 1024


def normalize(x, power=2, target_block_bytes=4 * 1024 * 1024):
    """Lp-normalize `x` along axis 1 (PyTorch `Normalize` forward semantics)."""
    orig_shape = x.shape
    N = orig_shape[0]
    C = orig_shape[1]
    HW = 1
    for d in orig_shape[2:]:
        HW *= d
    itemsize = jnp.dtype(x.dtype).itemsize

    kern = functools.partial(_normalize_kernel, power=power)
    compiler_params = pltpu.CompilerParams(
        dimension_semantics=("parallel", "parallel"),
        vmem_limit_bytes=_VMEM_LIMIT_BYTES,
    )

    if HW >= 128 and HW % 128 == 0:
        # ---- Lane-dense path: (N, C, HW) -> (N, C, chunks, 128), free contiguous view. ----
        chunks = HW // 128
        bytes_per_col = C * 128 * itemsize               # one (C, 1, 128) slab of one n

        # Sublane tile S over the `chunks` axis: multiple of 8 or the full extent.
        max_s = max(1, target_block_bytes // max(1, bytes_per_col))
        if chunks <= 8 or max_s >= chunks:
            S = chunks                                    # full extent (exempt from /8 rule)
        else:
            S = max(8, (min(max_s, chunks) // 8) * 8)

        # Batch tile: if one n's full spatial extent fits, pack several n per block.
        if S == chunks:
            per_n = C * chunks * 128 * itemsize
            TB = max(1, min(N, target_block_bytes // max(1, per_n)))
        else:
            TB = 1

        # Guarantee >=2 grid steps (v7x has 2 TensorCores) whenever the problem allows.
        if pl.cdiv(N, TB) * pl.cdiv(chunks, S) < 2:
            if N >= 2:
                TB = max(1, N // 2)
            elif S == chunks and chunks >= 16:
                S = max(8, ((chunks // 2) // 8) * 8)

        x4 = x.reshape(N, C, chunks, 128)
        grid = (pl.cdiv(N, TB), pl.cdiv(chunks, S))

        out = pl.pallas_call(
            kern,
            out_shape=jax.ShapeDtypeStruct((N, C, chunks, 128), x.dtype),
            grid_spec=pltpu.PrefetchScalarGridSpec(
                num_scalar_prefetch=0,
                grid=grid,
                in_specs=[pl.BlockSpec((TB, C, S, 128), lambda n, s: (n, 0, s, 0))],
                out_specs=pl.BlockSpec((TB, C, S, 128), lambda n, s: (n, 0, s, 0)),
            ),
            compiler_params=compiler_params,
        )(x4)
        return out.reshape(orig_shape)

    # ---- Fallback path (HW not a multiple of 128): (N, C, HW) with spatial on lanes. ----
    x3 = x.reshape(N, C, HW)
    if HW <= 128:
        tile_hw = HW                                      # full extent is exempt
    else:
        max_lanes = max(128, (target_block_bytes // max(1, C * itemsize)) // 128 * 128)
        tile_hw = min(_round_up(HW, 128), max_lanes)

    # Batch tile when the whole spatial extent fits in one block (tiny feature maps).
    if tile_hw >= HW:
        per_n = C * HW * itemsize
        TB = max(1, min(N, target_block_bytes // max(1, per_n)))
        if N >= 2 and pl.cdiv(N, TB) < 2:
            TB = max(1, N // 2)                           # keep >=2 steps for v7x's 2 TCs
    else:
        TB = 1

    grid = (pl.cdiv(N, TB), pl.cdiv(HW, tile_hw))

    out3 = pl.pallas_call(
        kern,
        out_shape=jax.ShapeDtypeStruct((N, C, HW), x.dtype),
        grid_spec=pltpu.PrefetchScalarGridSpec(
            num_scalar_prefetch=0,
            grid=grid,
            in_specs=[pl.BlockSpec((TB, C, tile_hw), lambda n, s: (n, 0, s))],
            out_specs=pl.BlockSpec((TB, C, tile_hw), lambda n, s: (n, 0, s)),
        ),
        compiler_params=compiler_params,
    )(x3)
    return out3.reshape(orig_shape)


if __name__ == "__main__":
    key = jax.random.PRNGKey(0)
    # Small NCHW input consistent with how Normalize is applied to feature maps.
    x = jax.random.normal(key, (2, 4, 16, 16), dtype=jnp.float32)

    out = jax.block_until_ready(normalize(x, power=2))

    # Reference check (plain JAX, mirrors the PyTorch forward exactly).
    norm_ref = jnp.power(jnp.sum(jnp.power(x, 2), axis=1, keepdims=True), 0.5)
    ref = x / norm_ref
    assert out.shape == x.shape and out.dtype == x.dtype
    assert jnp.max(jnp.abs(out - ref)) < 1e-5

    # Also exercise a non-2 power on the same data (p = 4, power-of-two sqrt-chain path).
    out4 = jax.block_until_ready(normalize(x, power=4))
    norm4 = jnp.power(jnp.sum(jnp.power(x, 4), axis=1, keepdims=True), 0.25)
    assert jnp.max(jnp.abs(out4 - x / norm4)) < 1e-4

    print("KERNEL_OK")
</pallas_src>

<mosaic_0001>
module attributes {stable_mosaic.version = 11 : i64} {
  func.func @_normalize_kernel(%arg0: i32, %arg1: i32, %arg2: memref<1x4x2x128xf32, #tpu.memory_space<vmem>>, %arg3: memref<1x4x2x128xf32, #tpu.memory_space<vmem>>) attributes {dimension_semantics = [#tpu.dimension_semantics<parallel>, #tpu.dimension_semantics<parallel>], iteration_bounds = array<i64: 2, 1>, scalar_prefetch = 0 : i64, scratch_operands = 0 : i64, tpu.core_type = #tpu.core_type<tc>, window_params = [{transform_indices = @transform_0, window_bounds = array<i64: 1, 4, 2, 128>}, {transform_indices = @transform_1, window_bounds = array<i64: 1, 4, 2, 128>}]} {
    %c0 = arith.constant 0 : index
    %c0_0 = arith.constant 0 : index
    %c0_1 = arith.constant 0 : index
    %c0_2 = arith.constant 0 : index
    %0 = vector.load %arg2[%c0, %c0_0, %c0_1, %c0_2] : memref<1x4x2x128xf32, #tpu.memory_space<vmem>>, vector<1x4x2x128xf32>
    %1 = arith.mulf %0, %0 : vector<1x4x2x128xf32>
    %cst = arith.constant dense<0.000000e+00> : vector<1x2x128xf32>
    %2 = vector.multi_reduction <add>, %1, %cst [1] : vector<1x4x2x128xf32> to vector<1x2x128xf32>
    %3 = vector.shape_cast %2 : vector<1x2x128xf32> to vector<1x1x2x128xf32>
    %4 = math.rsqrt %3 : vector<1x1x2x128xf32>
    %5 = vector.broadcast %4 : vector<1x1x2x128xf32> to vector<1x4x2x128xf32>
    %6 = arith.mulf %0, %5 : vector<1x4x2x128xf32>
    %c0_3 = arith.constant 0 : index
    %c0_4 = arith.constant 0 : index
    %c0_5 = arith.constant 0 : index
    %c0_6 = arith.constant 0 : index
    %7 = vector.load %arg3[%c0_3, %c0_4, %c0_5, %c0_6] : memref<1x4x2x128xf32, #tpu.memory_space<vmem>>, vector<1x4x2x128xf32>
    tpu.vector_store %arg3[%c0_3, %c0_4, %c0_5, %c0_6], %6 {strides = array<i32>} : memref<1x4x2x128xf32, #tpu.memory_space<vmem>>, vector<1x4x2x128xf32>,
    return
  }
  func.func @transform_0(%arg0: i32, %arg1: i32) -> (i32, i32, i32, i32) {
    %c0_i32 = arith.constant 0 : i32
    %c0_i32_0 = arith.constant 0 : i32
    %c0_i32_1 = arith.constant 0 : i32
    return %arg0, %c0_i32, %arg1, %c0_i32_0 : i32, i32, i32, i32
  }
  func.func @transform_1(%arg0: i32, %arg1: i32) -> (i32, i32, i32, i32) {
    %c0_i32 = arith.constant 0 : i32
    %c0_i32_0 = arith.constant 0 : i32
    %c0_i32_1 = arith.constant 0 : i32
    return %arg0, %c0_i32, %arg1, %c0_i32_0 : i32, i32, i32, i32
  }
}

</mosaic_0001>

<bundles_post_ra>
// kernel: tpu_custom_call.1
= control target key start
LH: loop header
LB: loop body
LE: loop exit
PB: predicated region body
PF: predicated region fallthrough
CT: control target
= control target key end

     0   :  { %6 = vsyncpa [#allocation3], 0  ;;  %s634_s0 = inlined_call_operand.hbm [shape: f32[2,4,2,128], index: 0, kind: input, shape index: {}]   ;;  %s635_s1 = inlined_call_operand.hbm [shape: f32[2,4,2,128], index: 1, kind: output, shape index: {}]  }
   0x1   :  { %8 = vsyncpa [#allocation3 + $0x1], 0 }
   0x2   :  { %9 = vsyncpa [#allocation4], 0 }
   0x3   :  { %11 = vsyncpa [#allocation4 + $0x1], 0  ;;  %s488_s6 = smov 0   ;;  %s490_s7 = smov 0  }
   0x4   :  { %s492_s8 = smov 0   ;;  %s494_s9 = smov 0  }
   0x5   :  { %s496_s10 = smov 0   ;;  %s498_s11 = smov 0  }
   0x6 LB: > { %s277_s12 = sadd.s32 4294967295, %s470_s11   ;;  %s278_s13 = sadd.s32 4294967294, %s470_s11   ;;  %s470_s11 = sphi %s498_s11, %s17_s11   ;;  %s466_s10 = sphi %s496_s10, %s646_s10   ;;  %s462_s9 = sphi %s494_s9, %s645_s9   ;;  %s458_s8 = sphi %s492_s8, %s644_s8   ;;  %s454_s7 = sphi %s490_s7, %s643_s7   ;;  %s450_s6 = sphi %s488_s6, %s642_s6  }
   0x7   : > { %s29_s14 = sadd.s32 1, %s466_s10  ;;  %s38_s15 = sadd.s32 1, %s458_s8 }
   0x8   : > { %p31_p0 = scmp.ge.s32.totalorder %s29_s14, 2  ;;  %p45_p1 = scmp.ne.s32.totalorder %s458_s8, %s454_s7 }
   0x9   : > { %p46_p2 = scmp.eq.s32.totalorder %s470_s11, 0  ;;  %p51_p3 = scmp.ne.s32.totalorder %s454_s7, %s450_s6 }
   0xa   : > { %s648_s14 = smov (%p31_p0, %s29_s14), 0  ;;  %p52_p5 = scmp.eq.s32.totalorder %s277_s12, 0 }
   0xb   : > { %p529_p4 = por %p46_p2, %p45_p1  ;;  %s33_s17 = ssub.s32 %s466_s10, %s648_s14 }
   0xc   : > { %p77_p6 = scmp.eq.s32.totalorder %s277_s12, 1  ;;  %p36_p7 = scmp.eq.s32.totalorder %s33_s17, 0 }
   0xd   : > { %p535_p8 = por %p52_p5, %p51_p3  ;;  %p83_p10 = scmp.eq.s32.totalorder %s278_s13, 1 }
   0xe   : > { %p539_p9 = por %p77_p6, %p45_p1  ;;  %p306_p13 = scmp.lt.s32.totalorder %s470_s11, 2 }
   0xf   : > { %s544_s20 = scalar_select %p36_p7, %s458_s8, %s38_s15  }
  0x10   : > { %p546_p11 = por %p83_p10, %p51_p3  ;;  %s103_s22 = sand.u32 1, %s458_s8  }
  0x11   : > { %s281_s23 = sshll.u32 %s103_s22, 3  ;;  %s292_s24 = sshll.u32 %s466_s10, 7 }
  0x12   : > { %s114_s27 = scalar_lea.hbm %s634_s0, %s292_s24  ;;  %s107_s28 = scalar_lea.vmem [#allocation2], %s281_s23 }
  0x13   : > { %s115_s29 = sshll.u32 %s107_s28, 4  ;;  %p559_p0 = pnand %p306_p13, %p529_p4  ;;  %s116_s29 = int_to_ptr.vmem [resolvable:$true] %s115_s29 }
  0x14   : > { %p284_p1 = scmp.ge.s32.totalorder %s470_s11, 1  ;;  %s104_s2 = scalar_lea.sflag [#allocation3], %s103_s22 }
  0x15   : > { %p364_p2 = pneg %p559_p0  ;;  %s375_s3 = scalar_lea.vmem %s116_s29, 128 }
  0x16   : > { %p376_p3 = scmp.ne.s32.totalorder %s116_s29, %s375_s3  ;;  %s472_s4 = smov [#allocation2]  }
  0x17   : > { %s380_s5 = sshll.u32 %s472_s4, 4  ;;  %s381_s5 = int_to_ptr.vmem [resolvable:$false] %s380_s5 }
  0x18   : > { %p378_p5 = pnand %p376_p3, %p364_p2  ;;  %s382_s12 = scalar_lea.vmem %s381_s5, 256 }
  0x19   : > { %p383_p7 = scmp.lt.s32.totalorder %s116_s29, %s381_s5  ;;  %p384_p10 = scmp.lt.s32.totalorder %s382_s12, %s375_s3 }
  0x1a   : > { %p379_p6 = pneg %p378_p5 }
  0x1b   : > { %p385_p12 = por %p384_p10, %p383_p7 }
  0x1d   : > { %p386_p4 = pnand %p385_p12, %p379_p6 }
  0x1f   : > { %389 = shalt.err (!%p386_p4)
}
  0x20   : > { %s473_s13 = smov 32   ;;  %s474_s15 = smov 2  }
  0x21   : > { %301 = dma.hbm_to_vmem [thread:$0]  (!%p559_p0), %s114_s27, 128, %s116_s29, %s104_s2, %s473_s13, %s473_s13, %s474_s15  }
  0x22   : > { %p123_p13 = scmp.lt.s32.totalorder %s470_s11, 3 }
  0x24   : > { %p124_p2 = pnand %p284_p1, %p123_p13 }
  0x25   : > { %s572_s16 = sand.u32 (!%p124_p2), 1, %s454_s7  }
  0x26   : > { %127 = sbr.rel (%p124_p2) target bundleno = 85 (0x55), region = 24  ;;  %s285_s17 = sshll.u32 (!%p124_p2), %s572_s16, 3 }
  0x27   : > { %s130_s22 = scalar_lea.sflag (!%p124_p2), [#allocation3], %s572_s16  ;;  %s133_s23 = scalar_lea.vmem (!%p124_p2), [#allocation2], %s285_s17 }
  0x2b   : > { %441 = dma.done.wait (%p535_p8), %s130_s22, 128  }
  0x2c   : > { %443 = vsyncadd (%p535_p8), %s130_s22, 4294967168  ;;  %vm160_vm0 = vcmask 1041408   ;;  %v152_v0 = vld [vmem:[%s133_s23] sm:$0x3]  ;;  %v153_v1 = vld [vmem:[%s133_s23 + $0x2] sm:$0x3] }
  0x2d   : > { %v154_v2 = vld [vmem:[%s133_s23 + $0x4] sm:$0x3]  ;;  %v155_v3 = vld [vmem:[%s133_s23 + $0x6] sm:$0x3]  ;;  %v156_v4 = vmul.f32 %v152_v0, %v152_v0  ;;  %v157_v5 = vmul.f32 %v153_v1, %v153_v1  ;;  %s151_s18 = scalar_lea.vmem [#allocation5], %s285_s17  ;;  %s293_s25 = sshll.u32 %s462_s9, 7 }
  0x2e   : > { %v158_v6 = vmul.f32 %v154_v2, %v154_v2  ;;  %v159_v7 = vmul.f32 %v155_v3, %v155_v3  ;;  %s192_s24 = sshll.u32 %s151_s18, 4  ;;  %s586_s28 = scalar_lea.hbm %s635_s1, %s293_s25  ;;  %s581_s24 = int_to_ptr.vmem [resolvable:$true] %s192_s24 }
  0x2f   : > { %v161_v8 = vsel %vm160_vm0, %v156_v4, 0.0  ;;  %v162_v9 = vsel %vm160_vm0, %v157_v5, 0.0  ;;  %s178_s9 = scalar_lea.sflag [#allocation4], %s572_s16  ;;  %s390_s29 = scalar_lea.vmem %s581_s24, 128 }
  0x30   : > { %v164_v10 = vsel %vm160_vm0, %v158_v6, 0.0  ;;  %v163_v11 = vadd.f32 %v162_v9, %v161_v8  ;;  %v166_v12 = vsel %vm160_vm0, %v159_v7, 0.0  ;;  %p391_p8 = scmp.ne.s32.totalorder %s581_s24, %s390_s29  ;;  %s475_s30 = smov [#allocation5]  }
  0x31   : > { %s394_s2 = sshll.u32 %s475_s30, 4  ;;  %s395_s2 = int_to_ptr.vmem [resolvable:$false] %s394_s2 }
  0x32   : > { %v165_v13 = vadd.f32 %v164_v10, %v163_v11  ;;  %p392_p12 = pnand %p391_p8, %p539_p9  ;;  %s396_s3 = scalar_lea.vmem %s395_s2, 256 }
  0x33   : > { %p397_p1 = scmp.lt.s32.totalorder %s581_s24, %s395_s2  ;;  %p398_p3 = scmp.lt.s32.totalorder %s396_s3, %s390_s29 }
  0x34   : > { %v167_v14 = vadd.f32 %v166_v12, %v165_v13  ;;  %p393_p0 = pneg %p392_p12 }
  0x35   : > { %p399_p5 = por %p398_p3, %p397_p1 }
  0x36   : > { %360 = vrsqrt.f32 %v167_v14 }
  0x37   : > { %p400_p6 = pnand %p399_p5, %p393_p0 }
  0x43   : > { %v361_v15 = vpop.eup %360 }
  0x44   : > { %v169_v16 = vmul.f32 %v361_v15, %v152_v0  ;;  %v170_v17 = vmul.f32 %v361_v15, %v153_v1  ;;  %v171_v18 = vmul.f32 %v361_v15, %v154_v2  ;;  %v172_v19 = vmul.f32 %v361_v15, %v155_v3 }
  0x46   : > { %173 = vst [vmem:[%s151_s18] sm:$0x3] %v169_v16  ;;  %174 = vst [vmem:[%s151_s18 + $0x2] sm:$0x3] %v170_v17 }
  0x47   : > { %175 = vst [vmem:[%s151_s18 + $0x4] sm:$0x3] %v171_v18  ;;  %176 = vst [vmem:[%s151_s18 + $0x6] sm:$0x3] %v172_v19 }
  0x48   : > { %403 = shalt.err (!%p400_p6)
}
  0x49   : > { %s404_s4 = scalar_lea.hbm %s586_s28, 128  ;;  %s408_s13 = scalar_lea.hbm %s635_s1, 256 }
  0x4a   : > { %p405_p7 = scmp.ne.s32.totalorder %s586_s28, %s404_s4  ;;  %p409_p13 = scmp.lt.s32.totalorder %s586_s28, %s635_s1 }
  0x4b   : > { %p410_p2 = scmp.lt.s32.totalorder %s408_s13, %s404_s4 }
  0x4c   : > { %p406_p10 = pnand %p405_p7, %p539_p9 }
  0x4d   : > { %p411_p8 = por %p410_p2, %p409_p13 }
  0x4e   : > { %p407_p4 = pneg %p406_p10 }
  0x50   : > { %p412_p12 = pnand %p411_p8, %p407_p4 }
  0x52   : > { %415 = shalt.err (!%p412_p12)
}
  0x53   : > { %s476_s22 = smov 32   ;;  %s477_s23 = smov 2  }
  0x54   : > { %296 = dma.vmem_to_hbm [thread:$0]  (%p539_p9), %s581_s24, 128, %s586_s28, %s178_s9, %s476_s22, %s476_s22, %s477_s23  }
  0x55 PF: > { %s207_s18 = sand.u32 1, %s450_s6   ;;  %p641_p0 = scmp.ge.s32.totalorder %s470_s11, 2 }
  0x56   : > { %s208_s25 = scalar_lea.sflag [#allocation4], %s207_s18 }
  0x57   : > { %p303_p1 = pnand %p641_p0, %p546_p11 }
  0x59   : > { %p304_p3 = pneg %p303_p1 }
  0x5b   : > { %445 = dma.done.wait (%p304_p3), %s208_s25, 128  }
  0x5c   : > { %447 = vsyncadd (%p304_p3), %s208_s25, 4294967168  ;;  %s17_s11 = sadd.s32 1, %s470_s11   ;;  %s642_s6 = smov %s454_s7 }
  0x5d   : > { %p14_p5 = scmp.ge.s32.totalorder %s17_s11, 4   ;;  %s643_s7 = smov %s458_s8 }
  0x5e   : > { %s644_s8 = smov %s544_s20  ;;  %s645_s9 = smov %s466_s10 }
  0x5f   : > { %s646_s10 = smov %s648_s14  ;;  %16 = sbr.rel (!%p14_p5) target bundleno = 6 (0x6), region = 69 }
  0x64   :  { %213 = vsyncpa [#allocation3], 1 }
  0x65   :  { %215 = vsyncpa [#allocation3 + $0x1], 1 }
  0x66   :  { %216 = vsyncpa [#allocation4], 1 }
  0x67   :  { %218 = vsyncpa [#allocation4 + $0x1], 1 }

</bundles_post_ra>
